<compile_context>
chip_gen: v6e
topology: v6e:2x2x1
jax: 0.10.0
libtpu: 0.0.40
codegen_flags: <defaults>
</compile_context>

<pallas_src>
import functools

import numpy as np
import jax
import jax.numpy as jnp
from jax.experimental import pallas as pl
from jax.experimental.pallas import tpu as pltpu


def qfunction_kernel(obs_ref, act_ref,
                     wc_ref, bc_ref,
                     w1o_ref, w1a_ref, b1_ref,
                     w2_ref, b2_ref,
                     w3_ref, b3_ref,
                     q_ref):
    """Batch on the lane (last) axis of every block.

    obs_ref : (C*L, Bt)   act_ref : (A, Bt)
    wc_ref  : (L, C*L)    bc_ref  : (L, 1)
    w1o_ref : (H, L)      w1a_ref : (H, A)   b1_ref : (H, 1)
    w2_ref  : (H, H)      b2_ref  : (H, 1)
    w3_ref  : (1, H)      b3_ref  : (1,)  scalar in SMEM
    q_ref   : (1, Bt)
    """
    cdt = wc_ref.dtype  # MXU input dtype (f32 or bf16); accumulation stays f32

    # --- preprocess: Conv1d(C, L, kernel_size=L) + Tanh == full contraction over (C, L)
    pre = jnp.tanh(
        jnp.dot(wc_ref[...], obs_ref[...],
                preferred_element_type=jnp.float32) + bc_ref[...])          # (L, Bt) f32

    # --- f_layer: Linear(L + A, H) + ReLU; concat([pre, act]) split into two matmuls
    h = (jnp.dot(w1o_ref[...], pre.astype(cdt), preferred_element_type=jnp.float32)
         + jnp.dot(w1a_ref[...], act_ref[...], preferred_element_type=jnp.float32)
         + b1_ref[...])
    h = jnp.maximum(h, 0.0)                                                 # (H, Bt) f32

    # --- trunk: Linear(H, H) + ReLU + Linear(H, 1)
    h2 = jnp.maximum(
        jnp.dot(w2_ref[...], h.astype(cdt), preferred_element_type=jnp.float32)
        + b2_ref[...], 0.0)                                                 # (H, Bt) f32
    q_ref[...] = (jnp.dot(w3_ref[...], h2.astype(cdt),
                          preferred_element_type=jnp.float32) + b3_ref[0])  # (1, Bt) f32


def prepare_params(params, compute_dtype=jnp.float32):
    """One-time (out of the hot path) weight massaging: conv flatten, W1 split,
    transposes for the batch-on-lanes layout, bias reshapes, optional bf16 cast."""
    L, C, _ = params["wc"].shape            # Conv1d weight: (OC=L, IC=C, K=L)
    H = params["w2"].shape[0]
    w1 = params["w1"]                       # (L + A, H), input-major
    return {
        "wc_t":  params["wc"].reshape(L, C * L).astype(compute_dtype),   # (L, C*L)
        "bc":    params["bc"].reshape(L, 1).astype(jnp.float32),
        "w1o_t": w1[:L].T.astype(compute_dtype),                         # (H, L)
        "w1a_t": w1[L:].T.astype(compute_dtype),                         # (H, A)
        "b1":    params["b1"].reshape(H, 1).astype(jnp.float32),
        "w2_t":  params["w2"].T.astype(compute_dtype),                   # (H, H)
        "b2":    params["b2"].reshape(H, 1).astype(jnp.float32),
        "w3_t":  params["w3"].T.astype(compute_dtype),                   # (1, H)
        "b3":    params["b3"].reshape(1).astype(jnp.float32),            # scalar (SMEM)
    }


@functools.partial(jax.jit, static_argnames=("b_tile",))
def qfunction_forward(obs, action, prepped, *, b_tile=1024):
    """obs: (B, C, L) float32 (NCL), action: (B, A) float32 -> (B, 1) float32."""
    B, C, L = obs.shape
    A = action.shape[1]
    CL = C * L
    H = prepped["w2_t"].shape[0]
    cdt = prepped["wc_t"].dtype

    # Lane-dense layout: put batch on the last (lane) axis.
    obs_t = obs.reshape(B, CL).T.astype(cdt)       # (C*L, B)
    act_t = action.T.astype(cdt)                   # (A, B)

    # Batch tile: whole array if it fits one tile, otherwise a multiple of 128.
    if B <= b_tile:
        bt = B
    else:
        bt = max(128, (b_tile // 128) * 128)
    grid = (pl.cdiv(B, bt),)

    res = lambda i: (0, 0)   # weights/biases: constant block -> VMEM-resident across grid

    q_t = pl.pallas_call(
        qfunction_kernel,
        out_shape=jax.ShapeDtypeStruct((1, B), jnp.float32),
        grid_spec=pltpu.PrefetchScalarGridSpec(
            num_scalar_prefetch=0,
            grid=grid,
            in_specs=[
                pl.BlockSpec((CL, bt), lambda i: (0, i)),            # obs (streamed)
                pl.BlockSpec((A, bt), lambda i: (0, i)),             # action (streamed)
                pl.BlockSpec((L, CL), res),                          # conv weight
                pl.BlockSpec((L, 1), res),                           # conv bias
                pl.BlockSpec((H, L), res),                           # W1 (obs part)
                pl.BlockSpec((H, A), res),                           # W1 (action part)
                pl.BlockSpec((H, 1), res),                           # b1
                pl.BlockSpec((H, H), res),                           # W2
                pl.BlockSpec((H, 1), res),                           # b2
                pl.BlockSpec((1, H), res),                           # W3
                pl.BlockSpec(memory_space=pltpu.MemorySpace.SMEM),   # b3 scalar
            ],
            out_specs=pl.BlockSpec((1, bt), lambda i: (0, i)),
        ),
        compiler_params=pltpu.CompilerParams(
            dimension_semantics=("parallel",),        # shard batch across TCs on v7x
            vmem_limit_bytes=32 * 1024 * 1024,        # safe on v5e/v6e/v7x
        ),
    )(obs_t, act_t,
      prepped["wc_t"], prepped["bc"],
      prepped["w1o_t"], prepped["w1a_t"], prepped["b1"],
      prepped["w2_t"], prepped["b2"],
      prepped["w3_t"], prepped["b3"])

    return q_t.T                                     # (B, 1)


def reference_forward(obs, action, params):
    B, C, L = obs.shape
    pre = jnp.tanh(obs.reshape(B, C * L)
                   @ params["wc"].reshape(L, C * L).T + params["bc"])
    oa = jnp.concatenate([pre, action], axis=1)
    h = jnp.maximum(oa @ params["w1"] + params["b1"], 0.0)
    h2 = jnp.maximum(h @ params["w2"] + params["b2"], 0.0)
    return h2 @ params["w3"] + params["b3"]


def init_params(key, C, L, A, H):
    ks = jax.random.split(key, 8)

    def u(k, shape, fan_in):
        bound = 1.0 / np.sqrt(fan_in)
        return jax.random.uniform(k, shape, jnp.float32, -bound, bound)

    return {
        # Conv1d(C, L, kernel_size=L): weight (OC=L, IC=C, K=L), bias (L,)
        "wc": u(ks[0], (L, C, L), C * L),
        "bc": u(ks[1], (L,), C * L),
        # Linear(L+A, H) stored input-major (in, out)
        "w1": u(ks[2], (L + A, H), L + A),
        "b1": u(ks[3], (H,), L + A),
        # Linear(H, H)
        "w2": u(ks[4], (H, H), H),
        "b2": u(ks[5], (H,), H),
        # Linear(H, 1)
        "w3": u(ks[6], (H, 1), H),
        "b3": u(ks[7], (1,), H),
    }


if __name__ == "__main__":
    B, C, L, A, H = 2, 4, 16, 4, 32  # obs_dim=(4,16), action_dim=4, hidden_dim=32

    key = jax.random.PRNGKey(0)
    k_obs, k_act, k_par = jax.random.split(key, 3)
    obs = jax.random.normal(k_obs, (B, C, L), jnp.float32)      # NCL layout
    action = jax.random.normal(k_act, (B, A), jnp.float32)
    params = init_params(k_par, C, L, A, H)

    # --- f32 path, single block (small batch) ---
    prepped = prepare_params(params)
    q = jax.block_until_ready(qfunction_forward(obs, action, prepped))
    q_ref = reference_forward(obs, action, params)
    assert q.shape == (B, 1)
    np.testing.assert_allclose(np.asarray(q), np.asarray(q_ref),
                               rtol=1e-5, atol=1e-5)

    # --- multi-block grid path: exercises batch streaming + parallel grid axis ---
    B2 = 384
    obs2 = jax.random.normal(jax.random.PRNGKey(1), (B2, C, L), jnp.float32)
    act2 = jax.random.normal(jax.random.PRNGKey(2), (B2, A), jnp.float32)
    q2 = jax.block_until_ready(qfunction_forward(obs2, act2, prepped, b_tile=128))
    q2_ref = reference_forward(obs2, act2, params)
    np.testing.assert_allclose(np.asarray(q2), np.asarray(q2_ref),
                               rtol=1e-5, atol=1e-5)

    # --- bf16 MXU-input path (memory-bound win); accumulation/activations in f32 ---
    prepped_bf16 = prepare_params(params, compute_dtype=jnp.bfloat16)
    q3 = jax.block_until_ready(qfunction_forward(obs2, act2, prepped_bf16, b_tile=128))
    np.testing.assert_allclose(np.asarray(q3), np.asarray(q2_ref),
                               rtol=1e-1, atol=1e-1)

    print("KERNEL_OK")
</pallas_src>

<mosaic_0001>
module attributes {stable_mosaic.version = 11 : i64} {
  func.func @qfunction_kernel(%arg0: i32, %arg1: memref<64x2xf32, #tpu.memory_space<vmem>>, %arg2: memref<4x2xf32, #tpu.memory_space<vmem>>, %arg3: memref<16x64xf32, #tpu.memory_space<vmem>>, %arg4: memref<16x1xf32, #tpu.memory_space<vmem>>, %arg5: memref<32x16xf32, #tpu.memory_space<vmem>>, %arg6: memref<32x4xf32, #tpu.memory_space<vmem>>, %arg7: memref<32x1xf32, #tpu.memory_space<vmem>>, %arg8: memref<32x32xf32, #tpu.memory_space<vmem>>, %arg9: memref<32x1xf32, #tpu.memory_space<vmem>>, %arg10: memref<1x32xf32, #tpu.memory_space<vmem>>, %arg11: memref<1xf32, #tpu.memory_space<smem>>, %arg12: memref<1x2xf32, #tpu.memory_space<vmem>>) attributes {dimension_semantics = [#tpu.dimension_semantics<parallel>], iteration_bounds = array<i64: 1>, scalar_prefetch = 0 : i64, scratch_operands = 0 : i64, tpu.core_type = #tpu.core_type<tc>, window_params = [{transform_indices = @transform_0, window_bounds = array<i64: 64, 2>}, {transform_indices = @transform_1, window_bounds = array<i64: 4, 2>}, {pipeline_mode = #tpu.pipeline_mode<synchronous>, transform_indices = @transform_2, window_bounds = array<i64: 16, 64>}, {pipeline_mode = #tpu.pipeline_mode<synchronous>, transform_indices = @transform_3, window_bounds = array<i64: 16, 1>}, {pipeline_mode = #tpu.pipeline_mode<synchronous>, transform_indices = @transform_4, window_bounds = array<i64: 32, 16>}, {pipeline_mode = #tpu.pipeline_mode<synchronous>, transform_indices = @transform_5, window_bounds = array<i64: 32, 4>}, {pipeline_mode = #tpu.pipeline_mode<synchronous>, transform_indices = @transform_6, window_bounds = array<i64: 32, 1>}, {pipeline_mode = #tpu.pipeline_mode<synchronous>, transform_indices = @transform_7, window_bounds = array<i64: 32, 32>}, {pipeline_mode = #tpu.pipeline_mode<synchronous>, transform_indices = @transform_8, window_bounds = array<i64: 32, 1>}, {pipeline_mode = #tpu.pipeline_mode<synchronous>, transform_indices = @transform_9, window_bounds = array<i64: 1, 32>}, {transform_indices = @transform_10, window_bounds = array<i64: 1>}, {transform_indices = @transform_11, window_bounds = array<i64: 1, 2>}]} {
    %c0 = arith.constant 0 : index
    %c0_0 = arith.constant 0 : index
    %0 = vector.load %arg3[%c0, %c0_0] : memref<16x64xf32, #tpu.memory_space<vmem>>, vector<16x64xf32>
    %c0_1 = arith.constant 0 : index
    %c0_2 = arith.constant 0 : index
    %1 = vector.load %arg1[%c0_1, %c0_2] : memref<64x2xf32, #tpu.memory_space<vmem>>, vector<64x2xf32>
    %cst = arith.constant dense<0.000000e+00> : vector<16x2xf32>
    %2 = tpu.matmul %0, %1, %cst {dimension_numbers = #tpu.dot_dimension_numbers<[1], [0], [0], [1], [0, 0, 1, 1], [], []>} : vector<16x64xf32>, vector<64x2xf32>, vector<16x2xf32> -> vector<16x2xf32>
    %c0_3 = arith.constant 0 : index
    %c0_4 = arith.constant 0 : index
    %3 = vector.load %arg4[%c0_3, %c0_4] : memref<16x1xf32, #tpu.memory_space<vmem>>, vector<16x1xf32>
    %4 = vector.broadcast %3 : vector<16x1xf32> to vector<16x2xf32>
    %5 = arith.addf %2, %4 : vector<16x2xf32>
    %6 = math.tanh %5 : vector<16x2xf32>
    %c0_5 = arith.constant 0 : index
    %c0_6 = arith.constant 0 : index
    %7 = vector.load %arg5[%c0_5, %c0_6] : memref<32x16xf32, #tpu.memory_space<vmem>>, vector<32x16xf32>
    %cst_7 = arith.constant dense<0.000000e+00> : vector<32x2xf32>
    %8 = tpu.matmul %7, %6, %cst_7 {dimension_numbers = #tpu.dot_dimension_numbers<[1], [0], [0], [1], [0, 0, 1, 1], [], []>} : vector<32x16xf32>, vector<16x2xf32>, vector<32x2xf32> -> vector<32x2xf32>
    %c0_8 = arith.constant 0 : index
    %c0_9 = arith.constant 0 : index
    %9 = vector.load %arg6[%c0_8, %c0_9] : memref<32x4xf32, #tpu.memory_space<vmem>>, vector<32x4xf32>
    %c0_10 = arith.constant 0 : index
    %c0_11 = arith.constant 0 : index
    %10 = vector.load %arg2[%c0_10, %c0_11] : memref<4x2xf32, #tpu.memory_space<vmem>>, vector<4x2xf32>
    %cst_12 = arith.constant dense<0.000000e+00> : vector<32x2xf32>
    %11 = tpu.matmul %9, %10, %cst_12 {dimension_numbers = #tpu.dot_dimension_numbers<[1], [0], [0], [1], [0, 0, 1, 1], [], []>} : vector<32x4xf32>, vector<4x2xf32>, vector<32x2xf32> -> vector<32x2xf32>
    %12 = arith.addf %8, %11 : vector<32x2xf32>
    %c0_13 = arith.constant 0 : index
    %c0_14 = arith.constant 0 : index
    %13 = vector.load %arg7[%c0_13, %c0_14] : memref<32x1xf32, #tpu.memory_space<vmem>>, vector<32x1xf32>
    %14 = vector.broadcast %13 : vector<32x1xf32> to vector<32x2xf32>
    %15 = arith.addf %12, %14 : vector<32x2xf32>
    %cst_15 = arith.constant 0.000000e+00 : f32
    %16 = vector.broadcast %cst_15 : f32 to vector<32x2xf32>
    %17 = arith.maximumf %15, %16 : vector<32x2xf32>
    %c0_16 = arith.constant 0 : index
    %c0_17 = arith.constant 0 : index
    %18 = vector.load %arg8[%c0_16, %c0_17] : memref<32x32xf32, #tpu.memory_space<vmem>>, vector<32x32xf32>
    %cst_18 = arith.constant dense<0.000000e+00> : vector<32x2xf32>
    %19 = tpu.matmul %18, %17, %cst_18 {dimension_numbers = #tpu.dot_dimension_numbers<[1], [0], [0], [1], [0, 0, 1, 1], [], []>} : vector<32x32xf32>, vector<32x2xf32>, vector<32x2xf32> -> vector<32x2xf32>
    %c0_19 = arith.constant 0 : index
    %c0_20 = arith.constant 0 : index
    %20 = vector.load %arg9[%c0_19, %c0_20] : memref<32x1xf32, #tpu.memory_space<vmem>>, vector<32x1xf32>
    %21 = vector.broadcast %20 : vector<32x1xf32> to vector<32x2xf32>
    %22 = arith.addf %19, %21 : vector<32x2xf32>
    %cst_21 = arith.constant 0.000000e+00 : f32
    %23 = vector.broadcast %cst_21 : f32 to vector<32x2xf32>
    %24 = arith.maximumf %22, %23 : vector<32x2xf32>
    %c0_22 = arith.constant 0 : index
    %c0_23 = arith.constant 0 : index
    %25 = vector.load %arg10[%c0_22, %c0_23] : memref<1x32xf32, #tpu.memory_space<vmem>>, vector<1x32xf32>
    %cst_24 = arith.constant dense<0.000000e+00> : vector<1x2xf32>
    %26 = tpu.matmul %25, %24, %cst_24 {dimension_numbers = #tpu.dot_dimension_numbers<[1], [0], [0], [1], [0, 0, 1, 1], [], []>} : vector<1x32xf32>, vector<32x2xf32>, vector<1x2xf32> -> vector<1x2xf32>
    %c0_25 = arith.constant 0 : index
    %27 = memref.load %arg11[%c0_25] : memref<1xf32, #tpu.memory_space<smem>>
    %28 = vector.broadcast %27 : f32 to vector<1x2xf32>
    %29 = arith.addf %26, %28 : vector<1x2xf32>
    %c0_26 = arith.constant 0 : index
    %c0_27 = arith.constant 0 : index
    %30 = vector.load %arg12[%c0_26, %c0_27] : memref<1x2xf32, #tpu.memory_space<vmem>>, vector<1x2xf32>
    tpu.vector_store %arg12[%c0_26, %c0_27], %29 {strides = array<i32>} : memref<1x2xf32, #tpu.memory_space<vmem>>, vector<1x2xf32>,
    return
  }
  func.func @transform_0(%arg0: i32) -> (i32, i32) {
    %c0_i32 = arith.constant 0 : i32
    %c0_i32_0 = arith.constant 0 : i32
    return %c0_i32, %arg0 : i32, i32
  }
  func.func @transform_1(%arg0: i32) -> (i32, i32) {
    %c0_i32 = arith.constant 0 : i32
    %c0_i32_0 = arith.constant 0 : i32
    return %c0_i32, %arg0 : i32, i32
  }
  func.func @transform_2(%arg0: i32) -> (i32, i32) {
    %c0_i32 = arith.constant 0 : i32
    %c0_i32_0 = arith.constant 0 : i32
    %c0_i32_1 = arith.constant 0 : i32
    return %c0_i32, %c0_i32_0 : i32, i32
  }
  func.func @transform_3(%arg0: i32) -> (i32, i32) {
    %c0_i32 = arith.constant 0 : i32
    %c0_i32_0 = arith.constant 0 : i32
    %c0_i32_1 = arith.constant 0 : i32
    return %c0_i32, %c0_i32_0 : i32, i32
  }
  func.func @transform_4(%arg0: i32) -> (i32, i32) {
    %c0_i32 = arith.constant 0 : i32
    %c0_i32_0 = arith.constant 0 : i32
    %c0_i32_1 = arith.constant 0 : i32
    return %c0_i32, %c0_i32_0 : i32, i32
  }
  func.func @transform_5(%arg0: i32) -> (i32, i32) {
    %c0_i32 = arith.constant 0 : i32
    %c0_i32_0 = arith.constant 0 : i32
    %c0_i32_1 = arith.constant 0 : i32
    return %c0_i32, %c0_i32_0 : i32, i32
  }
  func.func @transform_6(%arg0: i32) -> (i32, i32) {
    %c0_i32 = arith.constant 0 : i32
    %c0_i32_0 = arith.constant 0 : i32
    %c0_i32_1 = arith.constant 0 : i32
    return %c0_i32, %c0_i32_0 : i32, i32
  }
  func.func @transform_7(%arg0: i32) -> (i32, i32) {
    %c0_i32 = arith.constant 0 : i32
    %c0_i32_0 = arith.constant 0 : i32
    %c0_i32_1 = arith.constant 0 : i32
    return %c0_i32, %c0_i32_0 : i32, i32
  }
  func.func @transform_8(%arg0: i32) -> (i32, i32) {
    %c0_i32 = arith.constant 0 : i32
    %c0_i32_0 = arith.constant 0 : i32
    %c0_i32_1 = arith.constant 0 : i32
    return %c0_i32, %c0_i32_0 : i32, i32
  }
  func.func @transform_9(%arg0: i32) -> (i32, i32) {
    %c0_i32 = arith.constant 0 : i32
    %c0_i32_0 = arith.constant 0 : i32
    %c0_i32_1 = arith.constant 0 : i32
    return %c0_i32, %c0_i32_0 : i32, i32
  }
  func.func @transform_10(%arg0: i32) -> i32 {
    %c0_i32 = arith.constant 0 : i32
    %c0_i32_0 = arith.constant 0 : i32
    return %c0_i32 : i32
  }
  func.func @transform_11(%arg0: i32) -> (i32, i32) {
    %c0_i32 = arith.constant 0 : i32
    %c0_i32_0 = arith.constant 0 : i32
    return %c0_i32, %arg0 : i32, i32
  }
}

</mosaic_0001>

<bundles_post_ra>
// kernel: qfunction_forward.1
= control target key start
LH: loop header
LB: loop body
LE: loop exit
PB: predicated region body
PF: predicated region fallthrough
CT: control target
= control target key end

     0   :  { %vm62_vm0 = vcmask 523264   ;;  %v753_v2 = vmov 0   ;;  %s936_s0 = inlined_call_operand.vmem [shape: f32[64,2], index: 0, kind: input, shape index: {}]   ;;  %s937_s1 = inlined_call_operand.vmem [shape: f32[4,2], index: 1, kind: input, shape index: {}]   ;;  %s938_s2 = inlined_call_operand.vmem [shape: f32[16,64], index: 2, kind: input, shape index: {}]   ;;  %s939_s3 = inlined_call_operand.vmem [shape: f32[16,1], index: 3, kind: input, shape index: {}]   ;;  %s940_s4 = inlined_call_operand.vmem [shape: f32[32,16], index: 4, kind: input, shape index: {}]   ;;  %s941_s5 = inlined_call_operand.vmem [shape: f32[32,4], index: 5, kind: input, shape index: {}]   ;;  %s942_s6 = inlined_call_operand.vmem [shape: f32[32,1], index: 6, kind: input, shape index: {}]   ;;  %s943_s7 = inlined_call_operand.vmem [shape: f32[32,32], index: 7, kind: input, shape index: {}]   ;;  %s944_s8 = inlined_call_operand.vmem [shape: f32[32,1], index: 8, kind: input, shape index: {}]   ;;  %s945_s9 = inlined_call_operand.vmem [shape: f32[1,32], index: 9, kind: input, shape index: {}]   ;;  %s946_s10 = inlined_call_operand.<no memory space> [shape: f32[1], index: 10, kind: input, shape index: {}]   ;;  %s947_s11 = inlined_call_operand.hbm [shape: f32[1,2], index: 11, kind: output, shape index: {}]  }
   0x1   :  { %v49_v0 = vld [vmem:[%s936_s0 + $0x38] sm:$0xff]  ;;  %v48_v1 = vld [vmem:[%s936_s0 + $0x30] sm:$0xff]  ;;  %725 = vset.pattern.permute.xlu0 %v753_v2  ;;  %v47_v3 = vld [vmem:[%s936_s0 + $0x28] sm:$0xff]  ;;  %726 = vset.pattern.permute.xlu1 %v753_v2 }
   0x2   :  { %659 = vmatprep.subr.mxu0 %v49_v0  ;;  %v40_v4 = vld [vmem:[%s938_s2] sm:$0xff]  ;;  %v51_v5 = vld [vmem:[%s939_s3 + $0x8] sm:$0xff] }
   0x3   :  { %660 = vmatpush3.msra.mxu0 %v49_v0  ;;  %675 = vmatprep.mubr.msk.f32.mxu0 %vm62_vm0, %v40_v4  ;;  %v46_v6 = vld [vmem:[%s936_s0 + $0x20] sm:$0xff] }
   0x4   :  { %661 = vmatprep.subr.mxu0 %v48_v1  ;;  %59 = vperm.xlu0 %725, %v51_v5   ;;  %v50_v7 = vld [vmem:[%s939_s3] sm:$0xff] }
   0x5   :  { %662 = vmatpush3.msra.mxu0 %v48_v1 }
   0x6   :  { %663 = vmatprep.subr.mxu0 %v47_v3 }
   0x7   :  { %17 = vsyncpa [#allocation4], 0  ;;  %664 = vmatpush3.msra.mxu0 %v47_v3  ;;  %v45_v8 = vld [vmem:[%s936_s0 + $0x18] sm:$0xff]  ;;  %v44_v9 = vld [vmem:[%s936_s0 + $0x10] sm:$0xff]  ;;  %vm168_vm1 = vcmask 1043456   ;;  %vm155_vm2 = vcmask 31744  }
   0x8   :  { %665 = vmatprep.subr.mxu0 %v46_v6  ;;  %54 = vperm.xlu0 %725, %v50_v7   ;;  %v356_v10 = vld [vmem:[%s942_s6 + $0x8] sm:$0xff]  ;;  %v42_v12 = vld [vmem:[%s936_s0] sm:$0xff]  ;;  %v394_v13 = vld [vmem:[%s944_s8 + $0x18] sm:$0xff]  ;;  %vm257_vm3 = vcmask 130048   ;;  %vm415_vm4 = vcmask 261120   ;;  %v754_v2 = vmov 0.0  }
   0x9   :  { %666 = vmatpush3.msra.mxu0 %v46_v6  ;;  %v43_v11 = vld [vmem:[%s936_s0 + $0x8] sm:$0xff]  ;;  %v154_v16 = vld [vmem:[%s937_s1] sm:$0xf]  ;;  %v152_v19 = vld [vmem:[%s941_s5 + $0x10] sm:$0xff]  ;;  %vm755_vm5 = vmmov 0   ;;  %s756_s17 = smov [#allocation3]  }
   0xa   :  { %667 = vmatprep.subr.mxu0 %v45_v8  ;;  %v41_v14 = vld [vmem:[%s938_s2 + $0x8] sm:$0xff]  ;;  %v150_v17 = vld [vmem:[%s941_s5] sm:$0xff]  ;;  %678 = vmatprep.subr.msk.mxu1 %vm168_vm1, %v154_v16  ;;  %v153_v20 = vld [vmem:[%s941_s5 + $0x18] sm:$0xff]  ;;  %s601_s3 = sshll.u32 %s756_s17, 4  ;;  %vm593_vm6 = vcmask 8192   ;;  %s602_s3 = int_to_ptr.vmem [resolvable:$true] %s601_s3 }
   0xb   :  { %668 = vmatpush3.msra.mxu0 %v45_v8  ;;  %v392_v15 = vld [vmem:[%s944_s8 + $0x8] sm:$0xff]  ;;  %680 = vmatprep.mubr.msk.f32.mxu1 %vm155_vm2, %v150_v17  ;;  %v146_v21 = vld [vmem:[%s940_s4] sm:$0xff]  ;;  %v358_v22 = vld [vmem:[%s942_s6 + $0x18] sm:$0xff]  ;;  %s731_s18 = scalar_lea.vmem %s602_s3, 16  ;;  %s735_s19 = scalar_lea.vmem %s602_s3, 32 }
   0xc   :  { %669 = vmatprep.subr.mxu0 %v44_v9  ;;  %366 = vperm.xlu0 %725, %v356_v10   ;;  %v151_v18 = vld [vmem:[%s941_s5 + $0x8] sm:$0xff]  ;;  %v357_v23 = vld [vmem:[%s942_s6 + $0x10] sm:$0xff]  ;;  %v355_v24 = vld [vmem:[%s942_s6] sm:$0xff]  ;;  %p732_p0 = scmp.ne.s32.totalorder %s602_s3, %s731_s18  ;;  %p736_p1 = scmp.lt.s32.totalorder %s602_s3, %s602_s3 }
   0xd   :  { %670 = vmatpush3.msra.mxu0 %v44_v9  ;;  %679 = vmatpush3.msk.msra.mxu1 %vm168_vm1, %v154_v16  ;;  %v393_v25 = vld [vmem:[%s944_s8 + $0x10] sm:$0xff]  ;;  %v391_v26 = vld [vmem:[%s944_s8] sm:$0xff]  ;;  %v147_v35 = vld [vmem:[%s940_s4 + $0x8] sm:$0xff]  ;;  %p737_p2 = scmp.lt.s32.totalorder %s735_s19, %s731_s18 }
   0xe   :  { %671 = vmatprep.subr.mxu0 %v43_v11  ;;  %681 = vmatmul.mubr.msk.f32.vlgmr.msra.gmra.mxu1 %vm155_vm2, %v151_v18  ;;  %v148_v36 = vld [vmem:[%s940_s4 + $0x10] sm:$0xff]  ;;  %v149_v37 = vld [vmem:[%s940_s4 + $0x18] sm:$0xff]  ;;  %v387_v38 = vld [vmem:[%s943_s7] sm:$0xff] }
   0xf   :  { %672 = vmatpush3.msra.mxu0 %v43_v11  ;;  %683 = vmatprep.mubr.msk.f32.mxu1 %vm155_vm2, %v152_v19  ;;  %v388_v63 = vld [vmem:[%s943_s7 + $0x8] sm:$0xff]  ;;  %v389_v0 = vld [vmem:[%s943_s7 + $0x10] sm:$0xff]  ;;  %v390_v1 = vld [vmem:[%s943_s7 + $0x18] sm:$0xff]  ;;  %p738_p3 = por %p737_p2, %p736_p1 }
  0x10   :  { %673 = vmatprep.subr.mxu0 %v42_v12  ;;  %412 = vperm.xlu0 %725, %v394_v13   ;;  %v517_v19 = vld [vmem:[%s945_s9] sm:$0x1] }
  0x11   :  { %674 = vmatpush3.msra.mxu0 %v42_v12  ;;  %376 = vperm.xlu1 %726, %v358_v22   ;;  %p739_p4 = pnand %p738_p3, %p732_p0 }
  0x12   :  { %676 = vmatmul.mubr.msk.f32.vlgmr.msra.gmra.mxu0 %vm62_vm0, %v41_v14  ;;  %684 = vmatmul.mubr.msk.f32.gmra.mxu1 %vm155_vm2, %v153_v20  ;;  %v519_v20 = vstv %s946_s10 }
  0x13   :  { %690 = vmatprep.mubr.msk.f32.mxu1 %vm257_vm3, %v146_v21  ;;  %710 = vmatprep.subr.mxu0 %v754_v2 }
  0x14   :  { %402 = vperm.xlu0 %725, %v392_v15   ;;  %718 = vmatprep.mubr.msk.f32.mxu0 %vm755_vm5, %v754_v2 }
  0x15   :  { %371 = vperm.xlu1 %726, %v357_v23  }
  0x19   :  { %361 = vperm.xlu1 %726, %v355_v24  }
  0x1d   :  { %407 = vperm.xlu1 %726, %v393_v25  }
  0x21   :  { %397 = vperm.xlu1 %726, %v391_v26  }
  0x7f   :  { %v60_v27 = vpop.permute.xlu0 %59 }
  0x83   :  { %v55_v30 = vpop.permute.xlu0 %54 }
  0x87   :  { %v367_v54 = vpop.permute.xlu0 %366 }
  0x8b   :  { %v413_v3 = vpop.permute.xlu0 %412 }
  0x8c   :  { %v377_v42 = vpop.permute.xlu1 %376 }
  0x8f   :  { %v403_v9 = vpop.permute.xlu0 %402 }
  0x90   :  { %v372_v46 = vpop.permute.xlu1 %371 }
  0x94   :  { %v362_v58 = vpop.permute.xlu1 %361 }
  0x98   :  { %v408_v5 = vpop.permute.xlu1 %407 }
  0x9c   :  { %v398_v14 = vpop.permute.xlu1 %397 }
  0xce   :  { %v682_v39 = vpop.f32.mrf.mxu1 }
  0xd0   :  { %v238_v40 = vpop.f32.mrf.mxu1 }
  0xd2   :  { %v677_v28 = vpop.f32.mrf.mxu0  ;;  %v685_v41 = vpop.f32.mrf.mxu1 }
  0xd3   :  { %v141_v29 = vadd.f32 %v677_v28, %v60_v27 }
  0xd4   :  { %v135_v31 = vpop.f32.mrf.mxu0  ;;  %v248_v43 = vpop.f32.mrf.mxu1 }
  0xd5   :  { %727 = vtanh.f32 %v141_v29  ;;  %v136_v32 = vadd.f32 %v135_v31, %v55_v30 }
  0xd7   :  { %729 = vtanh.f32 %v136_v32 }
  0xe2   :  { %v728_v33 = vpop.eup %727 }
  0xe3   :  { %686 = vmatprep.subr.mxu1 %v728_v33 }
  0xe4   :  { %v730_v34 = vpop.eup %729  ;;  %687 = vmatpush3.msra.mxu1 %v728_v33 }
  0xe5   :  { %688 = vmatprep.subr.mxu1 %v730_v34 }
  0xe6   :  { %689 = vmatpush3.msra.mxu1 %v730_v34 }
  0xe7   :  { %691 = vmatmul.mubr.msk.f32.vlgmr.msra.gmra.mxu1 %vm257_vm3, %v147_v35 }
  0xe8   :  { %693 = vmatprep.mubr.msk.f32.mxu1 %vm257_vm3, %v148_v36 }
  0xeb   :  { %694 = vmatmul.mubr.msk.f32.gmra.mxu1 %vm257_vm3, %v149_v37 }
  0xec   :  { %704 = vmatprep.mubr.msk.f32.mxu1 %vm415_vm4, %v387_v38 }
 0x1a7   :  { %v692_v44 = vpop.f32.mrf.mxu1 }
 0x1a8   :  { %v342_v48 = vadd.f32 %v692_v44, %v682_v39 }
 0x1a9   :  { %v336_v45 = vpop.f32.mrf.mxu1 }
 0x1aa   :  { %v337_v51 = vadd.f32 %v336_v45, %v238_v40  ;;  %v380_v55 = vadd.f32 %v367_v54, %v342_v48 }
 0x1ab   :  { %v695_v47 = vpop.f32.mrf.mxu1 }
 0x1ac   :  { %v352_v49 = vadd.f32 %v695_v47, %v685_v41  ;;  %v379_v59 = vadd.f32 %v362_v58, %v337_v51  ;;  %v384_v61 = vmax.f32 %v380_v55, 0.0 }
 0x1ad   :  { %v346_v50 = vpop.f32.mrf.mxu1 }
 0x1ae   :  { %v382_v52 = vadd.f32 %v377_v42, %v352_v49  ;;  %v347_v53 = vadd.f32 %v346_v50, %v248_v43  ;;  %v383_v62 = vmax.f32 %v379_v59, 0.0 }
 0x1b0   :  { %v386_v56 = vmax.f32 %v382_v52, 0.0  ;;  %v381_v57 = vadd.f32 %v372_v46, %v347_v53 }
 0x1b2   :  { %v385_v60 = vmax.f32 %v381_v57, 0.0  ;;  %696 = vmatprep.subr.mxu1 %v386_v56 }
 0x1b3   :  { %697 = vmatpush3.msra.mxu1 %v386_v56 }
 0x1b4   :  { %698 = vmatprep.subr.mxu1 %v385_v60 }
 0x1b5   :  { %699 = vmatpush3.msra.mxu1 %v385_v60 }
 0x1b6   :  { %700 = vmatprep.subr.mxu1 %v384_v61 }
 0x1b7   :  { %701 = vmatpush3.msra.mxu1 %v384_v61 }
 0x1b8   :  { %702 = vmatprep.subr.mxu1 %v383_v62 }
 0x1b9   :  { %703 = vmatpush3.msra.mxu1 %v383_v62 }
 0x1ba   :  { %705 = vmatmul.mubr.msk.f32.vlgmr.msra.gmra.mxu1 %vm415_vm4, %v388_v63 }
 0x1bb   :  { %707 = vmatprep.mubr.msk.f32.mxu1 %vm415_vm4, %v389_v0 }
 0x1be   :  { %708 = vmatmul.mubr.msk.f32.gmra.mxu1 %vm415_vm4, %v390_v1 }
 0x27a   :  { %v706_v4 = vpop.f32.mrf.mxu1 }
 0x27b   :  { %v500_v11 = vadd.f32 %v706_v4, %v403_v9 }
 0x27c   :  { %v494_v6 = vpop.f32.mrf.mxu1 }
 0x27d   :  { %v495_v15 = vadd.f32 %v494_v6, %v398_v14  ;;  %v514_v17 = vmax.f32 %v500_v11, 0.0 }
 0x27e   :  { %v709_v7 = vpop.f32.mrf.mxu1 }
 0x27f   :  { %v510_v8 = vadd.f32 %v709_v7, %v413_v3  ;;  %v513_v18 = vmax.f32 %v495_v15, 0.0 }
 0x280   :  { %v504_v10 = vpop.f32.mrf.mxu1 }
 0x281   :  { %v516_v12 = vmax.f32 %v510_v8, 0.0  ;;  %v505_v13 = vadd.f32 %v504_v10, %v408_v5 }
 0x283   :  { %v515_v16 = vmax.f32 %v505_v13, 0.0  ;;  %711 = vmatpush3.msra.mxu0 %v516_v12 }
 0x284   :  { %712 = vmatprep.subr.mxu0 %v754_v2 }
 0x285   :  { %713 = vmatpush3.msra.mxu0 %v515_v16 }
 0x286   :  { %714 = vmatprep.subr.mxu0 %v754_v2 }
 0x287   :  { %715 = vmatpush3.msra.mxu0 %v514_v17 }
 0x288   :  { %716 = vmatprep.subr.mxu0 %v754_v2 }
 0x289   :  { %717 = vmatpush3.msra.mxu0 %v513_v18 }
 0x28a   :  { %719 = vmatmul.mubr.msk.f32.vlgmr.msra.gmra.mxu0 %vm415_vm4, %v517_v19 }
 0x34a   :  { %v589_v21 = vpop.f32.mrf.mxu0 }
 0x34b   :  { %v590_v22 = vadd.f32 %v589_v21, %v519_v20 }
 0x34c   :  { %v720_v23 = vpop.f32.mrf.mxu0 }
 0x34d   :  { %594 = vst.msk [vmem:[#allocation3] sm:$0x1] %vm593_vm6, %v590_v22 }
 0x34e   :  { %742 = shalt.err (!%p739_p4)
}
 0x34f   :  { %604 = dma.vmem_to_hbm [thread:$0]  %s602_s3, 16, %s947_s11, [#allocation4]  }
 0x350   :  { %751 = dma.done.wait [#allocation4], 16  }
 0x351   :  { %752 = vsyncadd [#allocation4], 4294967280 }
 0x352   :  { %608 = vsyncpa [#allocation4], 1 }

</bundles_post_ra>
